<compile_context>
chip_gen: v5e
topology: v5e:2x2
jax: 0.10.0
libtpu: 0.0.40
codegen_flags: <defaults>
</compile_context>

<pallas_src>
import jax
import jax.numpy as jnp
from jax.experimental import pallas as pl
from jax.experimental.pallas import tpu as pltpu


def _apply_dropout(h_f32, bits_u32, p):
    """Inverted dropout from precomputed uint32 bits; keep prob = 1 - p."""
    if p <= 0.0:
        return h_f32
    # keep iff bits >= p * 2^32  (bits uniform over [0, 2^32))
    thresh = jnp.uint32(min(int(p * 4294967296.0), 0xFFFFFFFF))
    keep = bits_u32 >= thresh
    scale = jnp.float32(1.0 / (1.0 - p))
    return jnp.where(keep, h_f32, jnp.float32(0.0)) * scale


def _make_kernel(training: bool, p: float):
    def kernel(*refs):
        if training:
            (x_ref, bits1_ref, bits2_ref,
             w1_ref, b1_ref, w2_ref, b2_ref, w3_ref, b3_ref, o_ref) = refs
        else:
            (x_ref, w1_ref, b1_ref, w2_ref, b2_ref, w3_ref, b3_ref,
             o_ref) = refs

        cdt = w1_ref.dtype  # compute dtype fed to the MXU (f32 or bf16)

        # fc1 + bias + ReLU (accumulation & elementwise in f32)
        h = jnp.dot(x_ref[...], w1_ref[...],
                    preferred_element_type=jnp.float32)
        h = jnp.maximum(h + b1_ref[...], 0.0)
        if training:
            h = _apply_dropout(h, bits1_ref[...], p)

        # fc2 + bias + ReLU
        h = jnp.dot(h.astype(cdt), w2_ref[...],
                    preferred_element_type=jnp.float32)
        h = jnp.maximum(h + b2_ref[...], 0.0)
        if training:
            h = _apply_dropout(h, bits2_ref[...], p)

        # fc3 (logits)
        out = jnp.dot(h.astype(cdt), w3_ref[...],
                      preferred_element_type=jnp.float32)
        o_ref[...] = (out + b3_ref[...]).astype(o_ref.dtype)

    return kernel


def mnist_2nn_forward(x, params, *, training=False, dropout_prob=0.5,
                      rng_key=None, block_b=512,
                      compute_dtype=jnp.float32):
    """Fused forward pass. x: (B, 784). Returns (B, 10) float32."""
    w1, b1, w2, b2, w3, b3 = params
    B = x.shape[0]
    if training:
        if not (0.0 <= float(dropout_prob) < 1.0):
            raise ValueError("dropout_prob must be in [0, 1).")
        if rng_key is None:
            rng_key = jax.random.PRNGKey(0)

    # Batch tile: multiple of 8 sublanes, capped for the VMEM budget.
    TB = min(int(block_b), max(B, 8))
    TB = max(8, (TB // 8) * 8)
    n_blocks = pl.cdiv(B, TB)
    B_pad = n_blocks * TB
    if B_pad != B:
        x = jnp.pad(x, ((0, B_pad - B), (0, 0)))

    cdt = jnp.dtype(compute_dtype)
    x_c = x.astype(cdt)
    w1c, w2c, w3c = (w.astype(cdt) for w in (w1, w2, w3))
    b1f, b2f, b3f = (b.astype(jnp.float32) for b in (b1, b2, b3))

    inputs = [x_c]
    in_specs = [pl.BlockSpec((TB, 784), lambda i: (i, 0))]
    if training:
        k1, k2 = jax.random.split(rng_key)
        bits1 = jax.random.bits(k1, (B_pad, 200), dtype=jnp.uint32)
        bits2 = jax.random.bits(k2, (B_pad, 200), dtype=jnp.uint32)
        inputs += [bits1, bits2]
        in_specs += [pl.BlockSpec((TB, 200), lambda i: (i, 0)),
                     pl.BlockSpec((TB, 200), lambda i: (i, 0))]
    inputs += [w1c, b1f, w2c, b2f, w3c, b3f]
    in_specs += [
        pl.BlockSpec((784, 200), lambda i: (0, 0)),   # w1 (resident)
        pl.BlockSpec((1, 200), lambda i: (0, 0)),     # b1
        pl.BlockSpec((200, 200), lambda i: (0, 0)),   # w2
        pl.BlockSpec((1, 200), lambda i: (0, 0)),     # b2
        pl.BlockSpec((200, 10), lambda i: (0, 0)),    # w3
        pl.BlockSpec((1, 10), lambda i: (0, 0)),      # b3
    ]

    flops = 2 * B_pad * (784 * 200 + 200 * 200 + 200 * 10)
    bytes_accessed = (sum(int(a.size) * a.dtype.itemsize for a in inputs)
                      + B_pad * 10 * 4)

    out = pl.pallas_call(
        _make_kernel(training, float(dropout_prob)),
        out_shape=jax.ShapeDtypeStruct((B_pad, 10), jnp.float32),
        grid=(n_blocks,),
        in_specs=in_specs,
        out_specs=pl.BlockSpec((TB, 10), lambda i: (i, 0)),
        compiler_params=pltpu.CompilerParams(
            dimension_semantics=("parallel",)),
        cost_estimate=pl.CostEstimate(
            flops=flops, transcendentals=0, bytes_accessed=bytes_accessed),
    )(*inputs)
    return out[:B]


def init_params(key):
    """Deterministic init mimicking nn.Linear's default U(-1/sqrt(fan_in), .)."""
    def linear(key, fan_in, fan_out):
        kw, kb = jax.random.split(key)
        bound = 1.0 / (fan_in ** 0.5)
        w = jax.random.uniform(kw, (fan_in, fan_out), jnp.float32, -bound, bound)
        b = jax.random.uniform(kb, (1, fan_out), jnp.float32, -bound, bound)
        return w, b

    k1, k2, k3 = jax.random.split(key, 3)
    w1, b1 = linear(k1, 784, 200)
    w2, b2 = linear(k2, 200, 200)
    w3, b3 = linear(k3, 200, 10)
    return (w1, b1, w2, b2, w3, b3)


def reference_forward(x, params):
    """Pure-JAX reference (eval mode: dropout = identity)."""
    w1, b1, w2, b2, w3, b3 = params
    h = jnp.maximum(x @ w1 + b1, 0.0)
    h = jnp.maximum(h @ w2 + b2, 0.0)
    return h @ w3 + b3


if __name__ == "__main__":
    key = jax.random.PRNGKey(0)
    kx, kp, kd = jax.random.split(key, 3)

    B = 8  # small demo batch; for real benchmarking use B >= 256 per tile
    x = jax.random.normal(kx, (B, 784), dtype=jnp.float32)
    params = init_params(kp)

    # eval-mode forward (matches PyTorch module.eval(); dropout is identity)
    out = jax.block_until_ready(mnist_2nn_forward(x, params, training=False))
    ref = reference_forward(x, params)
    assert out.shape == (B, 10)
    assert jnp.allclose(out, ref, atol=1e-4, rtol=1e-4)

    # bf16 compute path (x/weights bf16, f32 accumulation) — looser tolerance
    out_bf16 = jax.block_until_ready(
        mnist_2nn_forward(x, params, training=False,
                          compute_dtype=jnp.bfloat16))
    assert jnp.allclose(out_bf16, ref, atol=2e-1, rtol=1e-1)

    # training-mode path (inverted dropout from host-generated random bits)
    out_train = jax.block_until_ready(
        mnist_2nn_forward(x, params, training=True, dropout_prob=0.5,
                          rng_key=kd))
    assert out_train.shape == (B, 10)
    assert bool(jnp.all(jnp.isfinite(out_train)))

    print("KERNEL_OK")
</pallas_src>

<mosaic_0001>
module attributes {stable_mosaic.version = 11 : i64} {
  func.func @kernel(%arg0: i32, %arg1: memref<8x784xf32, #tpu.memory_space<vmem>>, %arg2: memref<784x200xf32, #tpu.memory_space<vmem>>, %arg3: memref<1x200xf32, #tpu.memory_space<vmem>>, %arg4: memref<200x200xf32, #tpu.memory_space<vmem>>, %arg5: memref<1x200xf32, #tpu.memory_space<vmem>>, %arg6: memref<200x10xf32, #tpu.memory_space<vmem>>, %arg7: memref<1x10xf32, #tpu.memory_space<vmem>>, %arg8: memref<8x10xf32, #tpu.memory_space<vmem>>) attributes {dimension_semantics = [#tpu.dimension_semantics<parallel>], iteration_bounds = array<i64: 1>, scalar_prefetch = 0 : i64, scratch_operands = 0 : i64, tpu.core_type = #tpu.core_type<tc>, window_params = [{transform_indices = @transform_0, window_bounds = array<i64: 8, 784>}, {pipeline_mode = #tpu.pipeline_mode<synchronous>, transform_indices = @transform_1, window_bounds = array<i64: 784, 200>}, {pipeline_mode = #tpu.pipeline_mode<synchronous>, transform_indices = @transform_2, window_bounds = array<i64: 1, 200>}, {pipeline_mode = #tpu.pipeline_mode<synchronous>, transform_indices = @transform_3, window_bounds = array<i64: 200, 200>}, {pipeline_mode = #tpu.pipeline_mode<synchronous>, transform_indices = @transform_4, window_bounds = array<i64: 1, 200>}, {pipeline_mode = #tpu.pipeline_mode<synchronous>, transform_indices = @transform_5, window_bounds = array<i64: 200, 10>}, {pipeline_mode = #tpu.pipeline_mode<synchronous>, transform_indices = @transform_6, window_bounds = array<i64: 1, 10>}, {transform_indices = @transform_7, window_bounds = array<i64: 8, 10>}]} {
    %c0 = arith.constant 0 : index
    %c0_0 = arith.constant 0 : index
    %0 = vector.load %arg1[%c0, %c0_0] : memref<8x784xf32, #tpu.memory_space<vmem>>, vector<8x784xf32>
    %c0_1 = arith.constant 0 : index
    %c0_2 = arith.constant 0 : index
    %1 = vector.load %arg2[%c0_1, %c0_2] : memref<784x200xf32, #tpu.memory_space<vmem>>, vector<784x200xf32>
    %cst = arith.constant dense<0.000000e+00> : vector<8x200xf32>
    %2 = tpu.matmul %0, %1, %cst {dimension_numbers = #tpu.dot_dimension_numbers<[1], [0], [0], [1], [0, 0, 1, 1], [], []>} : vector<8x784xf32>, vector<784x200xf32>, vector<8x200xf32> -> vector<8x200xf32>
    %c0_3 = arith.constant 0 : index
    %c0_4 = arith.constant 0 : index
    %3 = vector.load %arg3[%c0_3, %c0_4] : memref<1x200xf32, #tpu.memory_space<vmem>>, vector<1x200xf32>
    %4 = vector.broadcast %3 : vector<1x200xf32> to vector<8x200xf32>
    %5 = arith.addf %2, %4 : vector<8x200xf32>
    %cst_5 = arith.constant 0.000000e+00 : f32
    %6 = vector.broadcast %cst_5 : f32 to vector<8x200xf32>
    %7 = arith.maximumf %5, %6 : vector<8x200xf32>
    %c0_6 = arith.constant 0 : index
    %c0_7 = arith.constant 0 : index
    %8 = vector.load %arg4[%c0_6, %c0_7] : memref<200x200xf32, #tpu.memory_space<vmem>>, vector<200x200xf32>
    %cst_8 = arith.constant dense<0.000000e+00> : vector<8x200xf32>
    %9 = tpu.matmul %7, %8, %cst_8 {dimension_numbers = #tpu.dot_dimension_numbers<[1], [0], [0], [1], [0, 0, 1, 1], [], []>} : vector<8x200xf32>, vector<200x200xf32>, vector<8x200xf32> -> vector<8x200xf32>
    %c0_9 = arith.constant 0 : index
    %c0_10 = arith.constant 0 : index
    %10 = vector.load %arg5[%c0_9, %c0_10] : memref<1x200xf32, #tpu.memory_space<vmem>>, vector<1x200xf32>
    %11 = vector.broadcast %10 : vector<1x200xf32> to vector<8x200xf32>
    %12 = arith.addf %9, %11 : vector<8x200xf32>
    %cst_11 = arith.constant 0.000000e+00 : f32
    %13 = vector.broadcast %cst_11 : f32 to vector<8x200xf32>
    %14 = arith.maximumf %12, %13 : vector<8x200xf32>
    %c0_12 = arith.constant 0 : index
    %c0_13 = arith.constant 0 : index
    %15 = vector.load %arg6[%c0_12, %c0_13] : memref<200x10xf32, #tpu.memory_space<vmem>>, vector<200x10xf32>
    %cst_14 = arith.constant dense<0.000000e+00> : vector<8x10xf32>
    %16 = tpu.matmul %14, %15, %cst_14 {dimension_numbers = #tpu.dot_dimension_numbers<[1], [0], [0], [1], [0, 0, 1, 1], [], []>} : vector<8x200xf32>, vector<200x10xf32>, vector<8x10xf32> -> vector<8x10xf32>
    %c0_15 = arith.constant 0 : index
    %c0_16 = arith.constant 0 : index
    %17 = vector.load %arg7[%c0_15, %c0_16] : memref<1x10xf32, #tpu.memory_space<vmem>>, vector<1x10xf32>
    %18 = vector.broadcast %17 : vector<1x10xf32> to vector<8x10xf32>
    %19 = arith.addf %16, %18 : vector<8x10xf32>
    %c0_17 = arith.constant 0 : index
    %c0_18 = arith.constant 0 : index
    %20 = vector.load %arg8[%c0_17, %c0_18] : memref<8x10xf32, #tpu.memory_space<vmem>>, vector<8x10xf32>
    tpu.vector_store %arg8[%c0_17, %c0_18], %19 {strides = array<i32>} : memref<8x10xf32, #tpu.memory_space<vmem>>, vector<8x10xf32>,
    return
  }
  func.func @transform_0(%arg0: i32) -> (i32, i32) {
    %c0_i32 = arith.constant 0 : i32
    %c0_i32_0 = arith.constant 0 : i32
    return %arg0, %c0_i32 : i32, i32
  }
  func.func @transform_1(%arg0: i32) -> (i32, i32) {
    %c0_i32 = arith.constant 0 : i32
    %c0_i32_0 = arith.constant 0 : i32
    %c0_i32_1 = arith.constant 0 : i32
    return %c0_i32, %c0_i32_0 : i32, i32
  }
  func.func @transform_2(%arg0: i32) -> (i32, i32) {
    %c0_i32 = arith.constant 0 : i32
    %c0_i32_0 = arith.constant 0 : i32
    %c0_i32_1 = arith.constant 0 : i32
    return %c0_i32, %c0_i32_0 : i32, i32
  }
  func.func @transform_3(%arg0: i32) -> (i32, i32) {
    %c0_i32 = arith.constant 0 : i32
    %c0_i32_0 = arith.constant 0 : i32
    %c0_i32_1 = arith.constant 0 : i32
    return %c0_i32, %c0_i32_0 : i32, i32
  }
  func.func @transform_4(%arg0: i32) -> (i32, i32) {
    %c0_i32 = arith.constant 0 : i32
    %c0_i32_0 = arith.constant 0 : i32
    %c0_i32_1 = arith.constant 0 : i32
    return %c0_i32, %c0_i32_0 : i32, i32
  }
  func.func @transform_5(%arg0: i32) -> (i32, i32) {
    %c0_i32 = arith.constant 0 : i32
    %c0_i32_0 = arith.constant 0 : i32
    %c0_i32_1 = arith.constant 0 : i32
    return %c0_i32, %c0_i32_0 : i32, i32
  }
  func.func @transform_6(%arg0: i32) -> (i32, i32) {
    %c0_i32 = arith.constant 0 : i32
    %c0_i32_0 = arith.constant 0 : i32
    %c0_i32_1 = arith.constant 0 : i32
    return %c0_i32, %c0_i32_0 : i32, i32
  }
  func.func @transform_7(%arg0: i32) -> (i32, i32) {
    %c0_i32 = arith.constant 0 : i32
    %c0_i32_0 = arith.constant 0 : i32
    return %arg0, %c0_i32 : i32, i32
  }
}

</mosaic_0001>

<bundles_post_ra>
// kernel: tpu_custom_call.1
= control target key start
LH: loop header
LB: loop body
LE: loop exit
PB: predicated region body
PF: predicated region fallthrough
CT: control target
= control target key end

     0   :  { %vm236_vm0 = vcmask 130048   ;;  %s1707_s0 = inlined_call_operand.vmem [shape: f32[8,784], index: 0, kind: input, shape index: {}]   ;;  %s1708_s1 = inlined_call_operand.vmem [shape: f32[784,200], index: 1, kind: input, shape index: {}]   ;;  %s1709_s2 = inlined_call_operand.vmem [shape: f32[1,200], index: 2, kind: input, shape index: {}]   ;;  %s1710_s3 = inlined_call_operand.vmem [shape: f32[200,200], index: 3, kind: input, shape index: {}]   ;;  %s1711_s4 = inlined_call_operand.vmem [shape: f32[1,200], index: 4, kind: input, shape index: {}]   ;;  %s1712_s5 = inlined_call_operand.vmem [shape: f32[200,10], index: 5, kind: input, shape index: {}]   ;;  %s1713_s6 = inlined_call_operand.vmem [shape: f32[1,10], index: 6, kind: input, shape index: {}]   ;;  %s1714_s7 = inlined_call_operand.hbm [shape: f32[8,10], index: 7, kind: output, shape index: {}]  }
   0x1   :  { %v64_v0 = vld [vmem:[%s1708_s1 + $0xf0] sm:$0xff]  ;;  %v62_v3 = vld [vmem:[%s1708_s1 + $0xe0] sm:$0xff] }
   0x2   :  { %v128_v1 = vld [vmem:[%s1708_s1 + $0x2f0] sm:$0xff]  ;;  %240 = vmatpush.msra.mxu0 %v64_v0  ;;  %v126_v5 = vld [vmem:[%s1708_s1 + $0x2e0] sm:$0xff] }
   0x3   :  { %v160_v2 = vld [vmem:[%s1708_s1 + $0x3f0] sm:$0xff]  ;;  %280 = vmatpush.msra.mxu2 %v128_v1  ;;  %v158_v6 = vld [vmem:[%s1708_s1 + $0x3e0] sm:$0xff] }
   0x4   :  { %v96_v4 = vld [vmem:[%s1708_s1 + $0x1f0] sm:$0xff]  ;;  %300 = vmatpush.msra.mxu3 %v160_v2  ;;  %v94_v8 = vld [vmem:[%s1708_s1 + $0x1e0] sm:$0xff]  ;;  %241 = vmatpush.msra.mxu0 %v62_v3  ;;  %v65_v2 = vld [vmem:[%s1708_s1 + $0xf8] sm:$0xff] }
   0x5   :  { %260 = vmatpush.msra.mxu1 %v96_v4  ;;  %v60_v7 = vld [vmem:[%s1708_s1 + $0xd0] sm:$0xff]  ;;  %281 = vmatpush.msra.mxu2 %v126_v5  ;;  %v58_v11 = vld [vmem:[%s1708_s1 + $0xc0] sm:$0xff] }
   0x6   :  { %v124_v9 = vld [vmem:[%s1708_s1 + $0x2d0] sm:$0xff]  ;;  %301 = vmatpush.msra.mxu3 %v158_v6  ;;  %v122_v13 = vld [vmem:[%s1708_s1 + $0x2c0] sm:$0xff]  ;;  %242 = vmatpush.msra.mxu0 %v60_v7  ;;  %v63_v7 = vld [vmem:[%s1708_s1 + $0xe8] sm:$0xff] }
   0x7   :  { %v156_v10 = vld [vmem:[%s1708_s1 + $0x3d0] sm:$0xff]  ;;  %261 = vmatpush.msra.mxu1 %v94_v8  ;;  %282 = vmatpush.msra.mxu2 %v124_v9  ;;  %v154_v14 = vld [vmem:[%s1708_s1 + $0x3c0] sm:$0xff]  ;;  %v97_v8 = vld [vmem:[%s1708_s1 + $0x1f8] sm:$0xff] }
   0x8   :  { %v92_v12 = vld [vmem:[%s1708_s1 + $0x1d0] sm:$0xff]  ;;  %v90_v15 = vld [vmem:[%s1708_s1 + $0x1c0] sm:$0xff]  ;;  %302 = vmatpush.msra.mxu3 %v156_v10  ;;  %243 = vmatpush.msra.mxu0 %v58_v11 }
   0x9   :  { %262 = vmatpush.msra.mxu1 %v92_v12  ;;  %v56_v16 = vld [vmem:[%s1708_s1 + $0xb0] sm:$0xff]  ;;  %283 = vmatpush.msra.mxu2 %v122_v13  ;;  %v54_v20 = vld [vmem:[%s1708_s1 + $0xa0] sm:$0xff]  ;;  %v1064_v12 = vld [vmem:[%s1707_s0 + $0x18] sm:$0xff] }
   0xa   :  { %v120_v17 = vld [vmem:[%s1708_s1 + $0x2b0] sm:$0xff]  ;;  %303 = vmatpush.msra.mxu3 %v154_v14  ;;  %v118_v21 = vld [vmem:[%s1708_s1 + $0x2a0] sm:$0xff]  ;;  %244 = vmatpush.msra.mxu0 %v56_v16  ;;  %v95_v13 = vld [vmem:[%s1708_s1 + $0x1e8] sm:$0xff] }
   0xb   :  { %v152_v18 = vld [vmem:[%s1708_s1 + $0x3b0] sm:$0xff]  ;;  %263 = vmatpush.msra.mxu1 %v90_v15  ;;  %284 = vmatpush.msra.mxu2 %v120_v17  ;;  %v150_v22 = vld [vmem:[%s1708_s1 + $0x3a0] sm:$0xff]  ;;  %v61_v14 = vld [vmem:[%s1708_s1 + $0xd8] sm:$0xff] }
   0xc   :  { %v88_v19 = vld [vmem:[%s1708_s1 + $0x1b0] sm:$0xff]  ;;  %v86_v23 = vld [vmem:[%s1708_s1 + $0x1a0] sm:$0xff]  ;;  %304 = vmatpush.msra.mxu3 %v152_v18  ;;  %245 = vmatpush.msra.mxu0 %v54_v20  ;;  %v93_v17 = vld [vmem:[%s1708_s1 + $0x1d8] sm:$0xff] }
   0xd   :  { %264 = vmatpush.msra.mxu1 %v88_v19  ;;  %v52_v24 = vld [vmem:[%s1708_s1 + $0x90] sm:$0xff]  ;;  %285 = vmatpush.msra.mxu2 %v118_v21  ;;  %v50_v28 = vld [vmem:[%s1708_s1 + $0x80] sm:$0xff]  ;;  %v1086_v18 = vld [vmem:[%s1707_s0 + $0x8] sm:$0xff] }
   0xe   :  { %v116_v25 = vld [vmem:[%s1708_s1 + $0x290] sm:$0xff]  ;;  %305 = vmatpush.msra.mxu3 %v150_v22  ;;  %v114_v29 = vld [vmem:[%s1708_s1 + $0x280] sm:$0xff]  ;;  %246 = vmatpush.msra.mxu0 %v52_v24  ;;  %v59_v19 = vld [vmem:[%s1708_s1 + $0xc8] sm:$0xff] }
   0xf   :  { %v148_v26 = vld [vmem:[%s1708_s1 + $0x390] sm:$0xff]  ;;  %265 = vmatpush.msra.mxu1 %v86_v23  ;;  %286 = vmatpush.msra.mxu2 %v116_v25  ;;  %v146_v30 = vld [vmem:[%s1708_s1 + $0x380] sm:$0xff]  ;;  %v57_v22 = vld [vmem:[%s1708_s1 + $0xb8] sm:$0xff] }
  0x10   :  { %v84_v27 = vld [vmem:[%s1708_s1 + $0x190] sm:$0xff]  ;;  %v82_v31 = vld [vmem:[%s1708_s1 + $0x180] sm:$0xff]  ;;  %306 = vmatpush.msra.mxu3 %v148_v26  ;;  %247 = vmatpush.msra.mxu0 %v50_v28  ;;  %v91_v23 = vld [vmem:[%s1708_s1 + $0x1c8] sm:$0xff] }
  0x11   :  { %266 = vmatpush.msra.mxu1 %v84_v27  ;;  %v48_v32 = vld [vmem:[%s1708_s1 + $0x70] sm:$0xff]  ;;  %287 = vmatpush.msra.mxu2 %v114_v29  ;;  %v46_v36 = vld [vmem:[%s1708_s1 + $0x60] sm:$0xff]  ;;  %v55_v26 = vld [vmem:[%s1708_s1 + $0xa8] sm:$0xff] }
  0x12   :  { %v112_v33 = vld [vmem:[%s1708_s1 + $0x270] sm:$0xff]  ;;  %307 = vmatpush.msra.mxu3 %v146_v30  ;;  %v110_v37 = vld [vmem:[%s1708_s1 + $0x260] sm:$0xff]  ;;  %248 = vmatpush.msra.mxu0 %v48_v32  ;;  %v89_v27 = vld [vmem:[%s1708_s1 + $0x1b8] sm:$0xff] }
  0x13   :  { %v144_v34 = vld [vmem:[%s1708_s1 + $0x370] sm:$0xff]  ;;  %267 = vmatpush.msra.mxu1 %v82_v31  ;;  %288 = vmatpush.msra.mxu2 %v112_v33  ;;  %v142_v38 = vld [vmem:[%s1708_s1 + $0x360] sm:$0xff]  ;;  %v53_v30 = vld [vmem:[%s1708_s1 + $0x98] sm:$0xff] }
  0x14   :  { %v80_v35 = vld [vmem:[%s1708_s1 + $0x170] sm:$0xff]  ;;  %v78_v39 = vld [vmem:[%s1708_s1 + $0x160] sm:$0xff]  ;;  %308 = vmatpush.msra.mxu3 %v144_v34  ;;  %249 = vmatpush.msra.mxu0 %v46_v36  ;;  %v87_v31 = vld [vmem:[%s1708_s1 + $0x1a8] sm:$0xff] }
  0x15   :  { %268 = vmatpush.msra.mxu1 %v80_v35  ;;  %v44_v40 = vld [vmem:[%s1708_s1 + $0x50] sm:$0xff]  ;;  %289 = vmatpush.msra.mxu2 %v110_v37  ;;  %v42_v44 = vld [vmem:[%s1708_s1 + $0x40] sm:$0xff]  ;;  %v51_v34 = vld [vmem:[%s1708_s1 + $0x88] sm:$0xff] }
  0x16   :  { %v108_v41 = vld [vmem:[%s1708_s1 + $0x250] sm:$0xff]  ;;  %309 = vmatpush.msra.mxu3 %v142_v38  ;;  %v106_v45 = vld [vmem:[%s1708_s1 + $0x240] sm:$0xff]  ;;  %250 = vmatpush.msra.mxu0 %v44_v40  ;;  %v85_v35 = vld [vmem:[%s1708_s1 + $0x198] sm:$0xff] }
  0x17   :  { %v140_v42 = vld [vmem:[%s1708_s1 + $0x350] sm:$0xff]  ;;  %269 = vmatpush.msra.mxu1 %v78_v39  ;;  %290 = vmatpush.msra.mxu2 %v108_v41  ;;  %v138_v46 = vld [vmem:[%s1708_s1 + $0x340] sm:$0xff]  ;;  %v49_v38 = vld [vmem:[%s1708_s1 + $0x78] sm:$0xff] }
  0x18   :  { %v76_v43 = vld [vmem:[%s1708_s1 + $0x150] sm:$0xff]  ;;  %v74_v47 = vld [vmem:[%s1708_s1 + $0x140] sm:$0xff]  ;;  %310 = vmatpush.msra.mxu3 %v140_v42  ;;  %251 = vmatpush.msra.mxu0 %v42_v44  ;;  %v83_v39 = vld [vmem:[%s1708_s1 + $0x188] sm:$0xff] }
  0x19   :  { %270 = vmatpush.msra.mxu1 %v76_v43  ;;  %v40_v48 = vld [vmem:[%s1708_s1 + $0x30] sm:$0xff]  ;;  %291 = vmatpush.msra.mxu2 %v106_v45  ;;  %v38_v52 = vld [vmem:[%s1708_s1 + $0x20] sm:$0xff]  ;;  %v47_v42 = vld [vmem:[%s1708_s1 + $0x68] sm:$0xff] }
  0x1a   :  { %v104_v49 = vld [vmem:[%s1708_s1 + $0x230] sm:$0xff]  ;;  %311 = vmatpush.msra.mxu3 %v138_v46  ;;  %v102_v53 = vld [vmem:[%s1708_s1 + $0x220] sm:$0xff]  ;;  %252 = vmatpush.msra.mxu0 %v40_v48  ;;  %v81_v43 = vld [vmem:[%s1708_s1 + $0x178] sm:$0xff] }
  0x1b   :  { %v136_v50 = vld [vmem:[%s1708_s1 + $0x330] sm:$0xff]  ;;  %271 = vmatpush.msra.mxu1 %v74_v47  ;;  %292 = vmatpush.msra.mxu2 %v104_v49  ;;  %v134_v54 = vld [vmem:[%s1708_s1 + $0x320] sm:$0xff]  ;;  %v45_v46 = vld [vmem:[%s1708_s1 + $0x58] sm:$0xff] }
  0x1c   :  { %v72_v51 = vld [vmem:[%s1708_s1 + $0x130] sm:$0xff]  ;;  %v70_v55 = vld [vmem:[%s1708_s1 + $0x120] sm:$0xff]  ;;  %312 = vmatpush.msra.mxu3 %v136_v50  ;;  %253 = vmatpush.msra.mxu0 %v38_v52  ;;  %v79_v47 = vld [vmem:[%s1708_s1 + $0x168] sm:$0xff] }
  0x1d   :  { %272 = vmatpush.msra.mxu1 %v72_v51  ;;  %v36_v56 = vld [vmem:[%s1708_s1 + $0x10] sm:$0xff]  ;;  %293 = vmatpush.msra.mxu2 %v102_v53  ;;  %v34_v60 = vld [vmem:[%s1708_s1] sm:$0xff]  ;;  %v43_v50 = vld [vmem:[%s1708_s1 + $0x48] sm:$0xff] }
  0x1e   :  { %v100_v57 = vld [vmem:[%s1708_s1 + $0x210] sm:$0xff]  ;;  %313 = vmatpush.msra.mxu3 %v134_v54  ;;  %v98_v61 = vld [vmem:[%s1708_s1 + $0x200] sm:$0xff]  ;;  %254 = vmatpush.msra.mxu0 %v36_v56  ;;  %v77_v51 = vld [vmem:[%s1708_s1 + $0x158] sm:$0xff] }
  0x1f   :  { %v132_v58 = vld [vmem:[%s1708_s1 + $0x310] sm:$0xff]  ;;  %273 = vmatpush.msra.mxu1 %v70_v55  ;;  %294 = vmatpush.msra.mxu2 %v100_v57  ;;  %v130_v62 = vld [vmem:[%s1708_s1 + $0x300] sm:$0xff]  ;;  %v41_v54 = vld [vmem:[%s1708_s1 + $0x38] sm:$0xff] }
  0x20   :  { %v68_v59 = vld [vmem:[%s1708_s1 + $0x110] sm:$0xff]  ;;  %314 = vmatpush.msra.mxu3 %v132_v58  ;;  %v66_v1 = vld [vmem:[%s1708_s1 + $0x100] sm:$0xff]  ;;  %255 = vmatpush.msra.mxu0 %v34_v60  ;;  %v75_v55 = vld [vmem:[%s1708_s1 + $0x148] sm:$0xff] }
  0x21   :  { %v192_v63 = vld [vmem:[%s1708_s1 + $0x4f0] sm:$0xff]  ;;  %274 = vmatpush.msra.mxu1 %v68_v59  ;;  %295 = vmatpush.msra.mxu2 %v98_v61  ;;  %v190_v3 = vld [vmem:[%s1708_s1 + $0x4e0] sm:$0xff]  ;;  %v39_v58 = vld [vmem:[%s1708_s1 + $0x28] sm:$0xff] }
  0x22   :  { %v228_v0 = vld [vmem:[%s1708_s1 + $0x610] sm:$0xff]  ;;  %315 = vmatpush.msra.mxu3 %v130_v62  ;;  %320 = vmatpush.msrb.mxu0 %v192_v63  ;;  %v226_v5 = vld [vmem:[%s1708_s1 + $0x600] sm:$0xff]  ;;  %v73_v59 = vld [vmem:[%s1708_s1 + $0x138] sm:$0xff] }
  0x23   :  { %v224_v4 = vld [vmem:[%s1708_s1 + $0x5f0] sm:$0xff]  ;;  %374 = vmatpush.msrb.mxu2 %v228_v0  ;;  %275 = vmatpush.msra.mxu1 %v66_v1  ;;  %v222_v10 = vld [vmem:[%s1708_s1 + $0x5e0] sm:$0xff]  ;;  %v37_v63 = vld [vmem:[%s1708_s1 + $0x18] sm:$0xff] }
  0x24   :  { %v1041_v6 = vld [vmem:[%s1707_s0 + $0x10] sm:$0xff]  ;;  %380 = vmatpush.msrb.mxu3 %v65_v2  ;;  %321 = vmatpush.msrb.mxu0 %v190_v3  ;;  %v1058_v11 = vld [vmem:[%s1707_s0] sm:$0xff]  ;;  %v71_v0 = vld [vmem:[%s1708_s1 + $0x128] sm:$0xff] }
  0x25   :  { %v188_v9 = vld [vmem:[%s1708_s1 + $0x4d0] sm:$0xff]  ;;  %340 = vmatpush.msrb.mxu1 %v224_v4  ;;  %375 = vmatpush.msrb.mxu2 %v226_v5  ;;  %v186_v15 = vld [vmem:[%s1708_s1 + $0x4c0] sm:$0xff] }
  0x26   :  { %296 = vmatmul.f32.vlgmr.msra.gmra.mxu2 %v1041_v6  ;;  %381 = vmatpush.msrb.mxu3 %v63_v7  ;;  %v220_v16 = vld [vmem:[%s1708_s1 + $0x5d0] sm:$0xff]  ;;  %v218_v21 = vld [vmem:[%s1708_s1 + $0x5c0] sm:$0xff] }
  0x27   :  { %400 = vmatpush.msra.mxu2 %v97_v8  ;;  %322 = vmatpush.msrb.mxu0 %v188_v9  ;;  %v184_v20 = vld [vmem:[%s1708_s1 + $0x4b0] sm:$0xff]  ;;  %v182_v24 = vld [vmem:[%s1708_s1 + $0x4a0] sm:$0xff] }
  0x28   :  { %341 = vmatpush.msrb.mxu1 %v222_v10  ;;  %256 = vmatmul.f32.vlgmr.msra.gmra.mxu0 %v1058_v11  ;;  %v216_v25 = vld [vmem:[%s1708_s1 + $0x5b0] sm:$0xff]  ;;  %v214_v29 = vld [vmem:[%s1708_s1 + $0x5a0] sm:$0xff] }
  0x29   :  { %316 = vmatmul.f32.vlgmr.msra.gmra.mxu3 %v1064_v12  ;;  %401 = vmatpush.msra.mxu2 %v95_v13  ;;  %v180_v28 = vld [vmem:[%s1708_s1 + $0x490] sm:$0xff]  ;;  %v178_v32 = vld [vmem:[%s1708_s1 + $0x480] sm:$0xff] }
  0x2a   :  { %382 = vmatpush.msrb.mxu3 %v61_v14  ;;  %323 = vmatpush.msrb.mxu0 %v186_v15  ;;  %v212_v33 = vld [vmem:[%s1708_s1 + $0x590] sm:$0xff]  ;;  %v210_v37 = vld [vmem:[%s1708_s1 + $0x580] sm:$0xff] }
  0x2b   :  { %342 = vmatpush.msrb.mxu1 %v220_v16  ;;  %402 = vmatpush.msra.mxu2 %v93_v17  ;;  %v176_v36 = vld [vmem:[%s1708_s1 + $0x470] sm:$0xff]  ;;  %v174_v40 = vld [vmem:[%s1708_s1 + $0x460] sm:$0xff] }
  0x2c   :  { %276 = vmatmul.f32.vlgmr.msra.gmra.mxu1 %v1086_v18  ;;  %383 = vmatpush.msrb.mxu3 %v59_v19  ;;  %v208_v41 = vld [vmem:[%s1708_s1 + $0x570] sm:$0xff]  ;;  %v206_v45 = vld [vmem:[%s1708_s1 + $0x560] sm:$0xff] }
  0x2d   :  { %324 = vmatpush.msrb.mxu0 %v184_v20  ;;  %343 = vmatpush.msrb.mxu1 %v218_v21  ;;  %v172_v44 = vld [vmem:[%s1708_s1 + $0x450] sm:$0xff]  ;;  %v170_v48 = vld [vmem:[%s1708_s1 + $0x440] sm:$0xff] }
  0x2e   :  { %384 = vmatpush.msrb.mxu3 %v57_v22  ;;  %403 = vmatpush.msra.mxu2 %v91_v23  ;;  %v204_v49 = vld [vmem:[%s1708_s1 + $0x550] sm:$0xff]  ;;  %v202_v53 = vld [vmem:[%s1708_s1 + $0x540] sm:$0xff] }
  0x2f   :  { %325 = vmatpush.msrb.mxu0 %v182_v24  ;;  %344 = vmatpush.msrb.mxu1 %v216_v25  ;;  %v168_v52 = vld [vmem:[%s1708_s1 + $0x430] sm:$0xff]  ;;  %v166_v56 = vld [vmem:[%s1708_s1 + $0x420] sm:$0xff] }
  0x30   :  { %385 = vmatpush.msrb.mxu3 %v55_v26  ;;  %404 = vmatpush.msra.mxu2 %v89_v27  ;;  %v200_v57 = vld [vmem:[%s1708_s1 + $0x530] sm:$0xff]  ;;  %v198_v61 = vld [vmem:[%s1708_s1 + $0x520] sm:$0xff] }
  0x31   :  { %326 = vmatpush.msrb.mxu0 %v180_v28  ;;  %345 = vmatpush.msrb.mxu1 %v214_v29  ;;  %v164_v60 = vld [vmem:[%s1708_s1 + $0x410] sm:$0xff]  ;;  %v162_v1 = vld [vmem:[%s1708_s1 + $0x400] sm:$0xff] }
  0x32   :  { %386 = vmatpush.msrb.mxu3 %v53_v30  ;;  %405 = vmatpush.msra.mxu2 %v87_v31  ;;  %v1221_v62 = vld [vmem:[%s1707_s0 + $0x30] sm:$0xff]  ;;  %v1238_v3 = vld [vmem:[%s1707_s0 + $0x20] sm:$0xff] }
  0x33   :  { %327 = vmatpush.msrb.mxu0 %v178_v32  ;;  %346 = vmatpush.msrb.mxu1 %v212_v33  ;;  %v196_v2 = vld [vmem:[%s1708_s1 + $0x510] sm:$0xff] }
  0x34   :  { %387 = vmatpush.msrb.mxu3 %v51_v34  ;;  %406 = vmatpush.msra.mxu2 %v85_v35 }
  0x35   :  { %328 = vmatpush.msrb.mxu0 %v176_v36  ;;  %347 = vmatpush.msrb.mxu1 %v210_v37 }
  0x36   :  { %388 = vmatpush.msrb.mxu3 %v49_v38  ;;  %407 = vmatpush.msra.mxu2 %v83_v39 }
  0x37   :  { %329 = vmatpush.msrb.mxu0 %v174_v40  ;;  %348 = vmatpush.msrb.mxu1 %v208_v41 }
  0x38   :  { %389 = vmatpush.msrb.mxu3 %v47_v42  ;;  %408 = vmatpush.msra.mxu2 %v81_v43 }
  0x39   :  { %330 = vmatpush.msrb.mxu0 %v172_v44  ;;  %349 = vmatpush.msrb.mxu1 %v206_v45 }
  0x3a   :  { %390 = vmatpush.msrb.mxu3 %v45_v46  ;;  %409 = vmatpush.msra.mxu2 %v79_v47 }
  0x3b   :  { %331 = vmatpush.msrb.mxu0 %v170_v48  ;;  %350 = vmatpush.msrb.mxu1 %v204_v49 }
  0x3c   :  { %391 = vmatpush.msrb.mxu3 %v43_v50  ;;  %410 = vmatpush.msra.mxu2 %v77_v51 }
  0x3d   :  { %332 = vmatpush.msrb.mxu0 %v168_v52  ;;  %351 = vmatpush.msrb.mxu1 %v202_v53 }
  0x3e   :  { %392 = vmatpush.msrb.mxu3 %v41_v54  ;;  %411 = vmatpush.msra.mxu2 %v75_v55 }
  0x3f   :  { %333 = vmatpush.msrb.mxu0 %v166_v56  ;;  %352 = vmatpush.msrb.mxu1 %v200_v57 }
  0x40   :  { %393 = vmatpush.msrb.mxu3 %v39_v58  ;;  %412 = vmatpush.msra.mxu2 %v73_v59 }
  0x41   :  { %334 = vmatpush.msrb.mxu0 %v164_v60  ;;  %353 = vmatpush.msrb.mxu1 %v198_v61 }
  0x42   :  { %12 = vsyncpa [#allocation3], 0  ;;  %754 = vmatmul.msk.f32.vlgmr.msrb.gmra.mxu2 %vm236_vm0, %v1221_v62  ;;  %394 = vmatpush.msrb.mxu3 %v37_v63  ;;  %v35_v4 = vld [vmem:[%s1708_s1 + $0x8] sm:$0xff]  ;;  %v69_v5 = vld [vmem:[%s1708_s1 + $0x118] sm:$0xff]  ;;  %vm578_vm1 = vcmask 588800   ;;  %s745_s11 = sshll.u32 %s1714_s7, 4  ;;  %s746_s11 = int_to_ptr.hbm [resolvable:$true] %s745_s11 }
  0x43   :  { %413 = vmatpush.msra.mxu2 %v71_v0  ;;  %335 = vmatpush.msrb.mxu0 %v162_v1  ;;  %v194_v7 = vld [vmem:[%s1708_s1 + $0x500] sm:$0xff]  ;;  %v193_v8 = vld [vmem:[%s1708_s1 + $0x4f8] sm:$0xff]  ;;  %v1258_v9 = vld [vmem:[%s1707_s0 + $0x28] sm:$0xff]  ;;  %vm736_vm2 = vcmask 80896  }
  0x44   :  { %354 = vmatpush.msrb.mxu1 %v196_v2  ;;  %336 = vmatmul.f32.vlgmr.msrb.gmra.mxu0 %v1238_v3  ;;  %v67_v10 = vld [vmem:[%s1708_s1 + $0x108] sm:$0xff]  ;;  %v129_v13 = vld [vmem:[%s1708_s1 + $0x2f8] sm:$0xff] }
  0x45   :  { %395 = vmatpush.msrb.mxu3 %v35_v4  ;;  %414 = vmatpush.msra.mxu2 %v69_v5  ;;  %v191_v14 = vld [vmem:[%s1708_s1 + $0x4e8] sm:$0xff]  ;;  %v225_v15 = vld [vmem:[%s1708_s1 + $0x5f8] sm:$0xff] }
  0x46   :  { %355 = vmatpush.msrb.mxu1 %v194_v7  ;;  %v161_v16 = vld [vmem:[%s1708_s1 + $0x3f8] sm:$0xff]  ;;  %v127_v17 = vld [vmem:[%s1708_s1 + $0x2e8] sm:$0xff]  ;;  %420 = vmatpush.msra.mxu0 %v129_v13 }
  0x47   :  { %460 = vmatpush.msra.mxu3 %v193_v8  ;;  %356 = vmatmul.f32.vlgmr.msrb.gmra.mxu1 %v1258_v9  ;;  %v189_v19 = vld [vmem:[%s1708_s1 + $0x4d8] sm:$0xff]  ;;  %v223_v20 = vld [vmem:[%s1708_s1 + $0x5e8] sm:$0xff] }
  0x48   :  { %415 = vmatpush.msra.mxu2 %v67_v10  ;;  %v159_v21 = vld [vmem:[%s1708_s1 + $0x3e8] sm:$0xff]  ;;  %440 = vmatpush.msra.mxu1 %v161_v16  ;;  %v125_v22 = vld [vmem:[%s1708_s1 + $0x2d8] sm:$0xff] }
  0x49   :  { %461 = vmatpush.msra.mxu3 %v191_v14  ;;  %v187_v23 = vld [vmem:[%s1708_s1 + $0x4c8] sm:$0xff]  ;;  %421 = vmatpush.msra.mxu0 %v127_v17  ;;  %v221_v24 = vld [vmem:[%s1708_s1 + $0x5d8] sm:$0xff] }
  0x4a   :  { %480 = vmatpush.msrb.mxu2 %v225_v15  ;;  %v157_v25 = vld [vmem:[%s1708_s1 + $0x3d8] sm:$0xff]  ;;  %441 = vmatpush.msra.mxu1 %v159_v21  ;;  %v123_v26 = vld [vmem:[%s1708_s1 + $0x2c8] sm:$0xff]  ;;  %v546_v21 = vld [vmem:[%s1710_s3 + $0xc0] sm:$0xff] }
  0x4b   :  { %462 = vmatpush.msra.mxu3 %v189_v19  ;;  %v185_v27 = vld [vmem:[%s1708_s1 + $0x4b8] sm:$0xff]  ;;  %422 = vmatpush.msra.mxu0 %v125_v22  ;;  %v219_v28 = vld [vmem:[%s1708_s1 + $0x5c8] sm:$0xff] }
  0x4c   :  { %481 = vmatpush.msrb.mxu2 %v223_v20  ;;  %v155_v29 = vld [vmem:[%s1708_s1 + $0x3c8] sm:$0xff]  ;;  %442 = vmatpush.msra.mxu1 %v157_v25  ;;  %v121_v30 = vld [vmem:[%s1708_s1 + $0x2b8] sm:$0xff]  ;;  %v542_v25 = vld [vmem:[%s1710_s3 + $0xa0] sm:$0xff] }
  0x4d   :  { %463 = vmatpush.msra.mxu3 %v187_v23  ;;  %v183_v31 = vld [vmem:[%s1708_s1 + $0x4a8] sm:$0xff]  ;;  %423 = vmatpush.msra.mxu0 %v123_v26  ;;  %v217_v32 = vld [vmem:[%s1708_s1 + $0x5b8] sm:$0xff]  ;;  %v544_v23 = vld [vmem:[%s1710_s3 + $0xb0] sm:$0xff] }
  0x4e   :  { %482 = vmatpush.msrb.mxu2 %v221_v24  ;;  %v153_v33 = vld [vmem:[%s1708_s1 + $0x3b8] sm:$0xff]  ;;  %443 = vmatpush.msra.mxu1 %v155_v29  ;;  %v119_v34 = vld [vmem:[%s1708_s1 + $0x2a8] sm:$0xff]  ;;  %v538_v29 = vld [vmem:[%s1710_s3 + $0x80] sm:$0xff] }
  0x4f   :  { %464 = vmatpush.msra.mxu3 %v185_v27  ;;  %v181_v35 = vld [vmem:[%s1708_s1 + $0x498] sm:$0xff]  ;;  %424 = vmatpush.msra.mxu0 %v121_v30  ;;  %v215_v36 = vld [vmem:[%s1708_s1 + $0x5a8] sm:$0xff]  ;;  %v540_v27 = vld [vmem:[%s1710_s3 + $0x90] sm:$0xff] }
  0x50   :  { %483 = vmatpush.msrb.mxu2 %v219_v28  ;;  %v151_v37 = vld [vmem:[%s1708_s1 + $0x3a8] sm:$0xff]  ;;  %444 = vmatpush.msra.mxu1 %v153_v33  ;;  %v117_v38 = vld [vmem:[%s1708_s1 + $0x298] sm:$0xff]  ;;  %v534_v33 = vld [vmem:[%s1710_s3 + $0x60] sm:$0xff] }
  0x51   :  { %465 = vmatpush.msra.mxu3 %v183_v31  ;;  %v179_v39 = vld [vmem:[%s1708_s1 + $0x488] sm:$0xff]  ;;  %425 = vmatpush.msra.mxu0 %v119_v34  ;;  %v213_v40 = vld [vmem:[%s1708_s1 + $0x598] sm:$0xff]  ;;  %v536_v31 = vld [vmem:[%s1710_s3 + $0x70] sm:$0xff] }
  0x52   :  { %484 = vmatpush.msrb.mxu2 %v217_v32  ;;  %v149_v41 = vld [vmem:[%s1708_s1 + $0x398] sm:$0xff]  ;;  %445 = vmatpush.msra.mxu1 %v151_v37  ;;  %v115_v42 = vld [vmem:[%s1708_s1 + $0x288] sm:$0xff]  ;;  %v530_v37 = vld [vmem:[%s1710_s3 + $0x40] sm:$0xff] }
  0x53   :  { %466 = vmatpush.msra.mxu3 %v181_v35  ;;  %v177_v43 = vld [vmem:[%s1708_s1 + $0x478] sm:$0xff]  ;;  %426 = vmatpush.msra.mxu0 %v117_v38  ;;  %v211_v44 = vld [vmem:[%s1708_s1 + $0x588] sm:$0xff]  ;;  %v532_v35 = vld [vmem:[%s1710_s3 + $0x50] sm:$0xff] }
  0x54   :  { %485 = vmatpush.msrb.mxu2 %v215_v36  ;;  %v147_v45 = vld [vmem:[%s1708_s1 + $0x388] sm:$0xff]  ;;  %446 = vmatpush.msra.mxu1 %v149_v41  ;;  %v113_v46 = vld [vmem:[%s1708_s1 + $0x278] sm:$0xff]  ;;  %v526_v41 = vld [vmem:[%s1710_s3 + $0x20] sm:$0xff] }
  0x55   :  { %467 = vmatpush.msra.mxu3 %v179_v39  ;;  %v175_v47 = vld [vmem:[%s1708_s1 + $0x468] sm:$0xff]  ;;  %427 = vmatpush.msra.mxu0 %v115_v42  ;;  %v209_v48 = vld [vmem:[%s1708_s1 + $0x578] sm:$0xff]  ;;  %v528_v39 = vld [vmem:[%s1710_s3 + $0x30] sm:$0xff] }
  0x56   :  { %486 = vmatpush.msrb.mxu2 %v213_v40  ;;  %v145_v49 = vld [vmem:[%s1708_s1 + $0x378] sm:$0xff]  ;;  %447 = vmatpush.msra.mxu1 %v147_v45  ;;  %v111_v50 = vld [vmem:[%s1708_s1 + $0x268] sm:$0xff]  ;;  %v522_v45 = vld [vmem:[%s1710_s3] sm:$0xff] }
  0x57   :  { %468 = vmatpush.msra.mxu3 %v177_v43  ;;  %v173_v51 = vld [vmem:[%s1708_s1 + $0x458] sm:$0xff]  ;;  %428 = vmatpush.msra.mxu0 %v113_v46  ;;  %v207_v52 = vld [vmem:[%s1708_s1 + $0x568] sm:$0xff]  ;;  %v524_v43 = vld [vmem:[%s1710_s3 + $0x10] sm:$0xff] }
  0x58   :  { %487 = vmatpush.msrb.mxu2 %v211_v44  ;;  %v143_v53 = vld [vmem:[%s1708_s1 + $0x368] sm:$0xff]  ;;  %448 = vmatpush.msra.mxu1 %v145_v49  ;;  %v109_v54 = vld [vmem:[%s1708_s1 + $0x258] sm:$0xff] }
  0x59   :  { %469 = vmatpush.msra.mxu3 %v175_v47  ;;  %v171_v55 = vld [vmem:[%s1708_s1 + $0x448] sm:$0xff]  ;;  %429 = vmatpush.msra.mxu0 %v111_v50  ;;  %v205_v56 = vld [vmem:[%s1708_s1 + $0x558] sm:$0xff]  ;;  %v230_v47 = vld [vmem:[%s1709_s2] sm:$0x3] }
  0x5a   :  { %488 = vmatpush.msrb.mxu2 %v209_v48  ;;  %449 = vmatpush.msra.mxu1 %v143_v53  ;;  %v107_v57 = vld [vmem:[%s1708_s1 + $0x248] sm:$0xff]  ;;  %v141_v58 = vld [vmem:[%s1708_s1 + $0x358] sm:$0xff]  ;;  %v232_v48 = vperm.slane %v230_v47, 0 }
  0x5b   :  { %470 = vmatpush.msra.mxu3 %v173_v51  ;;  %430 = vmatpush.msra.mxu0 %v109_v54  ;;  %v169_v59 = vld [vmem:[%s1708_s1 + $0x438] sm:$0xff]  ;;  %v203_v60 = vld [vmem:[%s1708_s1 + $0x548] sm:$0xff] }
  0x5c   :  { %489 = vmatpush.msrb.mxu2 %v207_v52  ;;  %396 = vmatmul.f32.vlgmr.msrb.gmra.mxu3 %v1058_v11  ;;  %v105_v61 = vld [vmem:[%s1708_s1 + $0x238] sm:$0xff]  ;;  %v139_v63 = vld [vmem:[%s1708_s1 + $0x348] sm:$0xff] }
  0x5d   :  { %471 = vmatpush.msra.mxu3 %v171_v55  ;;  %431 = vmatpush.msra.mxu0 %v107_v57  ;;  %v167_v0 = vld [vmem:[%s1708_s1 + $0x428] sm:$0xff]  ;;  %v201_v11 = vld [vmem:[%s1708_s1 + $0x538] sm:$0xff] }
  0x5e   :  { %490 = vmatpush.msrb.mxu2 %v205_v56  ;;  %450 = vmatpush.msra.mxu1 %v141_v58  ;;  %v103_v1 = vld [vmem:[%s1708_s1 + $0x228] sm:$0xff]  ;;  %v137_v2 = vld [vmem:[%s1708_s1 + $0x338] sm:$0xff]  ;;  %v570_v58 = vld [vmem:[%s1710_s3 + $0x180] sm:$0xff] }
  0x5f   :  { %472 = vmatpush.msra.mxu3 %v169_v59  ;;  %416 = vmatmul.f32.vlgmr.msra.gmra.mxu2 %v1086_v18  ;;  %v165_v4 = vld [vmem:[%s1708_s1 + $0x418] sm:$0xff]  ;;  %v199_v5 = vld [vmem:[%s1708_s1 + $0x528] sm:$0xff] }
  0x60   :  { %491 = vmatpush.msrb.mxu2 %v203_v60  ;;  %432 = vmatpush.msra.mxu0 %v105_v61  ;;  %v101_v7 = vld [vmem:[%s1708_s1 + $0x218] sm:$0xff]  ;;  %v135_v18 = vld [vmem:[%s1708_s1 + $0x328] sm:$0xff]  ;;  %v568_v61 = vld [vmem:[%s1710_s3 + $0x170] sm:$0xff] }
  0x61   :  { %451 = vmatpush.msra.mxu1 %v139_v63  ;;  %473 = vmatpush.msra.mxu3 %v167_v0  ;;  %v163_v8 = vld [vmem:[%s1708_s1 + $0x408] sm:$0xff]  ;;  %v197_v10 = vld [vmem:[%s1708_s1 + $0x518] sm:$0xff] }
  0x62   :  { %492 = vmatpush.msrb.mxu2 %v201_v11  ;;  %433 = vmatpush.msra.mxu0 %v103_v1  ;;  %v99_v13 = vld [vmem:[%s1708_s1 + $0x208] sm:$0xff]  ;;  %v133_v14 = vld [vmem:[%s1708_s1 + $0x318] sm:$0xff] }
  0x63   :  { %452 = vmatpush.msra.mxu1 %v137_v2  ;;  %474 = vmatpush.msra.mxu3 %v165_v4  ;;  %v195_v15 = vld [vmem:[%s1708_s1 + $0x508] sm:$0xff]  ;;  %v229_v16 = vld [vmem:[%s1708_s1 + $0x618] sm:$0xff]  ;;  %v566_v2 = vld [vmem:[%s1710_s3 + $0x160] sm:$0xff] }
  0x64   :  { %493 = vmatpush.msrb.mxu2 %v199_v5  ;;  %434 = vmatpush.msra.mxu0 %v101_v7  ;;  %v131_v17 = vld [vmem:[%s1708_s1 + $0x308] sm:$0xff]  ;;  %v549_v20 = vld [vmem:[%s1710_s3 + $0xd8] sm:$0xff]  ;;  %v564_v7 = vld [vmem:[%s1710_s3 + $0x150] sm:$0xff] }
  0x65   :  { %453 = vmatpush.msra.mxu1 %v135_v18  ;;  %475 = vmatpush.msra.mxu3 %v163_v8  ;;  %v227_v19 = vld [vmem:[%s1708_s1 + $0x608] sm:$0xff]  ;;  %v545_v24 = vld [vmem:[%s1710_s3 + $0xb8] sm:$0xff] }
  0x66   :  { %494 = vmatpush.msrb.mxu2 %v197_v10  ;;  %476 = vmatmul.f32.vlgmr.msra.gmra.mxu3 %v1238_v3  ;;  %v552_v3 = vld [vmem:[%s1710_s3 + $0xf0] sm:$0xff]  ;;  %v547_v22 = vld [vmem:[%s1710_s3 + $0xc8] sm:$0xff]  ;;  %v541_v28 = vld [vmem:[%s1710_s3 + $0x98] sm:$0xff] }
  0x67   :  { %435 = vmatpush.msra.mxu0 %v99_v13  ;;  %454 = vmatpush.msra.mxu1 %v133_v14  ;;  %v543_v26 = vld [vmem:[%s1710_s3 + $0xa8] sm:$0xff]  ;;  %v537_v32 = vld [vmem:[%s1710_s3 + $0x78] sm:$0xff]  ;;  %v562_v10 = vld [vmem:[%s1710_s3 + $0x140] sm:$0xff] }
  0x68   :  { %495 = vmatpush.msrb.mxu2 %v195_v15  ;;  %436 = vmatmul.f32.vlgmr.msra.gmra.mxu0 %v1041_v6  ;;  %v553_v6 = vld [vmem:[%s1710_s3 + $0xf8] sm:$0xff]  ;;  %v539_v30 = vld [vmem:[%s1710_s3 + $0x88] sm:$0xff]  ;;  %v560_v14 = vld [vmem:[%s1710_s3 + $0x130] sm:$0xff] }
  0x69   :  { %496 = vmatmul.f32.vlgmr.msrb.gmra.mxu2 %v1258_v9  ;;  %514 = vmatpush.msrb.mxu0 %v229_v16  ;;  %v550_v9 = vld [vmem:[%s1710_s3 + $0xe0] sm:$0xff]  ;;  %v535_v34 = vld [vmem:[%s1710_s3 + $0x68] sm:$0xff]  ;;  %v533_v36 = vld [vmem:[%s1710_s3 + $0x58] sm:$0xff] }
  0x6a   :  { %455 = vmatpush.msra.mxu1 %v131_v17  ;;  %v531_v38 = vld [vmem:[%s1710_s3 + $0x48] sm:$0xff]  ;;  %v529_v40 = vld [vmem:[%s1710_s3 + $0x38] sm:$0xff]  ;;  %609 = vmatpush.msrb.mxu3 %v570_v58  ;;  %v558_v16 = vld [vmem:[%s1710_s3 + $0x120] sm:$0xff] }
  0x6b   :  { %456 = vmatmul.f32.vlgmr.msra.gmra.mxu1 %v1064_v12  ;;  %515 = vmatpush.msrb.mxu0 %v227_v19  ;;  %v551_v12 = vld [vmem:[%s1710_s3 + $0xe8] sm:$0xff]  ;;  %v525_v44 = vld [vmem:[%s1710_s3 + $0x18] sm:$0xff]  ;;  %v556_v19 = vld [vmem:[%s1710_s3 + $0x110] sm:$0xff] }
  0x6c   :  { %582 = vmatpush.msrb.mxu1 %v552_v3  ;;  %v527_v42 = vld [vmem:[%s1710_s3 + $0x28] sm:$0xff]  ;;  %v569_v63 = vld [vmem:[%s1710_s3 + $0x178] sm:$0xff]  ;;  %610 = vmatpush.msrb.mxu3 %v568_v61  ;;  %v680_v58 = vld [vmem:[%s1712_s5 + $0x80] sm:$0xff] }
  0x6d   :  { %622 = vmatpush.msra.mxu0 %v553_v6  ;;  %v523_v46 = vld [vmem:[%s1710_s3 + $0x8] sm:$0xff]  ;;  %v565_v18 = vld [vmem:[%s1710_s3 + $0x158] sm:$0xff]  ;;  %v554_v6 = vld [vmem:[%s1710_s3 + $0x100] sm:$0xff] }
  0x6e   :  { %583 = vmatpush.msrb.mxu1 %v550_v9  ;;  %v571_v59 = vld [vmem:[%s1710_s3 + $0x188] sm:$0xff]  ;;  %611 = vmatpush.msrb.mxu3 %v566_v2  ;;  %v561_v15 = vld [vmem:[%s1710_s3 + $0x138] sm:$0xff] }
  0x6f   :  { %623 = vmatpush.msra.mxu0 %v551_v12  ;;  %649 = vmatpush.msra.mxu2 %v571_v59  ;;  %v567_v4 = vld [vmem:[%s1710_s3 + $0x168] sm:$0xff]  ;;  %v557_v3 = vld [vmem:[%s1710_s3 + $0x118] sm:$0xff]  ;;  %v233_v12 = vperm.slane %v230_v47, 1  ;;  %v672_v47 = vld [vmem:[%s1712_s5 + $0x40] sm:$0xff] }
  0x70   :  { %755 = vmatmul.msk.f32.vlgmr.msrb.gmra.mxu0 %vm236_vm0, %v1221_v62  ;;  %v548_v62 = vld [vmem:[%s1710_s3 + $0xd0] sm:$0xff]  ;;  %612 = vmatpush.msrb.mxu3 %v564_v7  ;;  %v563_v13 = vld [vmem:[%s1710_s3 + $0x148] sm:$0xff]  ;;  %v572_v59 = vld [vmem:[%s1711_s4] sm:$0x3]  ;;  %s787_s4 = smov [#allocation2]  }
  0x71   :  { %584 = vmatpush.msrb.mxu1 %v548_v62  ;;  %624 = vmatpush.msra.mxu0 %v549_v20  ;;  %v559_v17 = vld [vmem:[%s1710_s3 + $0x128] sm:$0xff]  ;;  %v575_v61 = vperm.slane %v572_v59, 1  ;;  %s743_s9 = sshll.u32 %s787_s4, 4  ;;  %s744_s9 = int_to_ptr.vmem [resolvable:$true] %s743_s9 }
  0x72   :  { %650 = vmatpush.msra.mxu2 %v569_v63  ;;  %613 = vmatpush.msrb.mxu3 %v562_v10  ;;  %v555_v9 = vld [vmem:[%s1710_s3 + $0x108] sm:$0xff]  ;;  %v760_v10 = vld [vmem:[%s1713_s6] ss:$0 sm:$0xff] }
  0x73   :  { %585 = vmatpush.msrb.mxu1 %v546_v21  ;;  %625 = vmatpush.msra.mxu0 %v547_v22 }
  0x74   :  { %651 = vmatpush.msra.mxu2 %v567_v4  ;;  %614 = vmatpush.msrb.mxu3 %v560_v14 }
  0x75   :  { %586 = vmatpush.msrb.mxu1 %v544_v23  ;;  %626 = vmatpush.msra.mxu0 %v545_v24 }
  0x76   :  { %652 = vmatpush.msra.mxu2 %v565_v18  ;;  %615 = vmatpush.msrb.mxu3 %v558_v16 }
  0x77   :  { %587 = vmatpush.msrb.mxu1 %v542_v25  ;;  %627 = vmatpush.msra.mxu0 %v543_v26 }
  0x78   :  { %653 = vmatpush.msra.mxu2 %v563_v13  ;;  %616 = vmatpush.msrb.mxu3 %v556_v19 }
  0x79   :  { %588 = vmatpush.msrb.mxu1 %v540_v27  ;;  %628 = vmatpush.msra.mxu0 %v541_v28 }
  0x7a   :  { %654 = vmatpush.msra.mxu2 %v561_v15  ;;  %617 = vmatpush.msrb.mxu3 %v554_v6 }
  0x7b   :  { %589 = vmatpush.msrb.mxu1 %v538_v29  ;;  %629 = vmatpush.msra.mxu0 %v539_v30 }
  0x7c   :  { %655 = vmatpush.msra.mxu2 %v559_v17 }
  0x7d   :  { %590 = vmatpush.msrb.mxu1 %v536_v31  ;;  %630 = vmatpush.msra.mxu0 %v537_v32 }
  0x7e   :  { %656 = vmatpush.msra.mxu2 %v557_v3 }
  0x7f   :  { %591 = vmatpush.msrb.mxu1 %v534_v33  ;;  %631 = vmatpush.msra.mxu0 %v535_v34  ;;  %v679_v34 = vld [vmem:[%s1712_s5 + $0x78] sm:$0xff] }
  0x80   :  { %657 = vmatpush.msra.mxu2 %v555_v9  ;;  %696 = vmatpush.msra.mxu3 %v679_v34 }
  0x81   :  { %592 = vmatpush.msrb.mxu1 %v532_v35  ;;  %632 = vmatpush.msra.mxu0 %v533_v36  ;;  %v678_v35 = vld [vmem:[%s1712_s5 + $0x70] sm:$0xff]  ;;  %v677_v36 = vld [vmem:[%s1712_s5 + $0x68] sm:$0xff] }
  0x82   :  { %697 = vmatpush.msra.mxu3 %v678_v35 }
  0x83   :  { %593 = vmatpush.msrb.mxu1 %v530_v37  ;;  %633 = vmatpush.msra.mxu0 %v531_v38  ;;  %v688_v37 = vld [vmem:[%s1712_s5 + $0xc0] sm:$0xff]  ;;  %v687_v38 = vld [vmem:[%s1712_s5 + $0xb8] sm:$0xff] }
  0x84   :  { %723 = vmatpush.msrb.mxu2 %v688_v37  ;;  %698 = vmatpush.msra.mxu3 %v677_v36 }
  0x85   :  { %594 = vmatpush.msrb.mxu1 %v528_v39  ;;  %634 = vmatpush.msra.mxu0 %v529_v40  ;;  %v676_v39 = vld [vmem:[%s1712_s5 + $0x60] sm:$0xff]  ;;  %v686_v40 = vld [vmem:[%s1712_s5 + $0xb0] sm:$0xff] }
  0x86   :  { %724 = vmatpush.msrb.mxu2 %v687_v38  ;;  %699 = vmatpush.msra.mxu3 %v676_v39 }
  0x87   :  { %595 = vmatpush.msrb.mxu1 %v526_v41  ;;  %635 = vmatpush.msra.mxu0 %v527_v42  ;;  %v675_v41 = vld [vmem:[%s1712_s5 + $0x58] sm:$0xff]  ;;  %v685_v42 = vld [vmem:[%s1712_s5 + $0xa8] sm:$0xff] }
  0x88   :  { %725 = vmatpush.msrb.mxu2 %v686_v40  ;;  %700 = vmatpush.msra.mxu3 %v675_v41 }
  0x89   :  { %596 = vmatpush.msrb.mxu1 %v524_v43  ;;  %636 = vmatpush.msra.mxu0 %v525_v44  ;;  %v674_v43 = vld [vmem:[%s1712_s5 + $0x50] sm:$0xff]  ;;  %v684_v44 = vld [vmem:[%s1712_s5 + $0xa0] sm:$0xff] }
  0x8a   :  { %726 = vmatpush.msrb.mxu2 %v685_v42  ;;  %701 = vmatpush.msra.mxu3 %v674_v43 }
  0x8b   :  { %597 = vmatpush.msrb.mxu1 %v522_v45  ;;  %637 = vmatpush.msra.mxu0 %v523_v46  ;;  %v673_v45 = vld [vmem:[%s1712_s5 + $0x48] sm:$0xff]  ;;  %v683_v46 = vld [vmem:[%s1712_s5 + $0x98] sm:$0xff] }
  0x8c   :  { %727 = vmatpush.msrb.mxu2 %v684_v44  ;;  %702 = vmatpush.msra.mxu3 %v673_v45 }
  0x8e   :  { %728 = vmatpush.msrb.mxu2 %v683_v46  ;;  %703 = vmatpush.msra.mxu3 %v672_v47 }
  0xa5   :  { %v257_v49 = vpop.f32.mrf.mxu0 }
  0xa6   :  { %v258_v50 = vadd.f32 %v257_v49, %v232_v48  ;;  %v671_v48 = vld [vmem:[%s1712_s5 + $0x38] sm:$0xff]  ;;  %v670_v49 = vld [vmem:[%s1712_s5 + $0x30] sm:$0xff] }
  0xa7   :  { %704 = vmatpush.msra.mxu3 %v671_v48 }
  0xa9   :  { %v277_v51 = vpop.f32.mrf.mxu1  ;;  %v297_v53 = vpop.f32.mrf.mxu2  ;;  %705 = vmatpush.msra.mxu3 %v670_v49 }
  0xaa   :  { %v278_v52 = vadd.f32 %v277_v51, %v258_v50  ;;  %v669_v50 = vld [vmem:[%s1712_s5 + $0x28] sm:$0xff]  ;;  %v668_v51 = vld [vmem:[%s1712_s5 + $0x20] sm:$0xff] }
  0xab   :  { %706 = vmatpush.msra.mxu3 %v669_v50 }
  0xac   :  { %v298_v54 = vadd.f32 %v297_v53, %v278_v52  ;;  %v317_v55 = vpop.f32.mrf.mxu3  ;;  %v667_v52 = vld [vmem:[%s1712_s5 + $0x18] sm:$0xff]  ;;  %v666_v53 = vld [vmem:[%s1712_s5 + $0x10] sm:$0xff] }
  0xad   :  { %707 = vmatpush.msra.mxu3 %v668_v51 }
  0xae   :  { %v318_v56 = vadd.f32 %v317_v55, %v298_v54  ;;  %v682_v54 = vld [vmem:[%s1712_s5 + $0x90] sm:$0xff]  ;;  %v665_v55 = vld [vmem:[%s1712_s5 + $0x8] sm:$0xff] }
  0xaf   :  { %708 = vmatpush.msra.mxu3 %v667_v52  ;;  %729 = vmatpush.msrb.mxu2 %v682_v54 }
  0xb1   :  { %709 = vmatpush.msra.mxu3 %v666_v53 }
  0xb3   :  { %710 = vmatpush.msra.mxu3 %v665_v55 }
  0xc1   :  { %v337_v57 = vpop.f32.mrf.mxu0 }
  0xc2   :  { %v338_v60 = vadd.f32 %v337_v57, %v318_v56  ;;  %v681_v56 = vld [vmem:[%s1712_s5 + $0x88] sm:$0xff]  ;;  %v664_v57 = vld [vmem:[%s1712_s5] sm:$0xff] }
  0xc3   :  { %730 = vmatpush.msrb.mxu2 %v681_v56  ;;  %711 = vmatpush.msra.mxu3 %v664_v57 }
  0xc4   :  { %v357_v0 = vpop.f32.mrf.mxu1 }
  0xc5   :  { %v358_v11 = vadd.f32 %v357_v0, %v338_v60  ;;  %v377_v1 = vpop.f32.mrf.mxu2  ;;  %731 = vmatpush.msrb.mxu2 %v680_v58  ;;  %v574_v60 = vperm.slane %v572_v59, 0 }
  0xc7   :  { %v378_v5 = vadd.f32 %v377_v1, %v358_v11 }
  0xc9   :  { %v520_v8 = vmax.f32 %v378_v5, 0.0 }
  0xcb   :  { %598 = vmatmul.f32.vlgmr.msrb.gmra.mxu1 %v520_v8  ;;  %638 = vmatmul.f32.vlgmr.msra.gmra.mxu0 %v520_v8 }
  0xdf   :  { %v397_v62 = vpop.f32.mrf.mxu3 }
  0xe0   :  { %v398_v20 = vadd.f32 %v397_v62, %v233_v12 }
  0xe2   :  { %v417_v21 = vpop.f32.mrf.mxu2 }
  0xe3   :  { %v418_v22 = vadd.f32 %v417_v21, %v398_v20 }
  0xe5   :  { %v437_v23 = vpop.f32.mrf.mxu0 }
  0xe6   :  { %v438_v24 = vadd.f32 %v437_v23, %v418_v22 }
  0xe8   :  { %v457_v25 = vpop.f32.mrf.mxu1 }
  0xe9   :  { %v458_v26 = vadd.f32 %v457_v25, %v438_v24  ;;  %v477_v27 = vpop.f32.mrf.mxu3 }
  0xeb   :  { %v478_v28 = vadd.f32 %v477_v27, %v458_v26 }
  0xec   :  { %v497_v29 = vpop.f32.mrf.mxu2 }
  0xed   :  { %v498_v30 = vadd.f32 %v497_v29, %v478_v28  ;;  %v517_v31 = vpop.f32.mrf.mxu0 }
  0xef   :  { %v518_v32 = vadd.f32 %v517_v31, %v498_v30 }
  0xf1   :  { %v521_v33 = vmax.f32 %v518_v32, 0.0 }
  0xf3   :  { %756 = vmatmul.msk.f32.vlgmr.msrb.gmra.mxu3 %vm578_vm1, %v521_v33  ;;  %757 = vmatmul.msk.f32.vlgmr.msra.gmra.mxu2 %vm578_vm1, %v521_v33 }
 0x148   :  { %v599_v63 = vpop.f32.mrf.mxu1  ;;  %v639_v0 = vpop.f32.mrf.mxu0 }
 0x149   :  { %v600_v11 = vadd.f32 %v599_v63, %v574_v60  ;;  %v640_v1 = vadd.f32 %v639_v0, %v575_v61 }
 0x176   :  { %v619_v2 = vpop.f32.mrf.mxu3  ;;  %v659_v4 = vpop.f32.mrf.mxu2 }
 0x177   :  { %v620_v5 = vadd.f32 %v619_v2, %v600_v11  ;;  %v660_v7 = vadd.f32 %v659_v4, %v640_v1 }
 0x179   :  { %v662_v18 = vmax.f32 %v620_v5, 0.0  ;;  %v663_v8 = vmax.f32 %v660_v7, 0.0 }
 0x17b   :  { %712 = vmatmul.f32.vlgmr.msra.gmra.mxu3 %v662_v18  ;;  %758 = vmatmul.msk.f32.vlgmr.msrb.gmra.mxu2 %vm578_vm1, %v663_v8 }
 0x1fe   :  { %v713_v13 = vpop.f32.mrf.mxu3  ;;  %v733_v15 = vpop.f32.mrf.mxu2 }
 0x1ff   :  { %v714_v14 = vadd.f32 %v760_v10, %v713_v13 }
 0x201   :  { %v734_v16 = vadd.f32 %v733_v15, %v714_v14 }
 0x203   :  { %737 = vst.msk [vmem:[#allocation2] sm:$0xff] %vm736_vm2, %v734_v16 }
 0x204   :  { %748 = dma.vmem_to_hbm [thread:$0]  %s744_s9, 128, %s746_s11, [#allocation3]  }
 0x205   :  { %785 = dma.done.wait [#allocation3], 128  }
 0x206   :  { %786 = vsyncadd [#allocation3], 4294967168 }
 0x207   :  { %753 = vsyncpa [#allocation3], 1 }

</bundles_post_ra>
